<compile_context>
chip_gen: v7x
topology: tpu7x:2x2x1
jax: 0.10.0
libtpu: 0.0.40
codegen_flags: <defaults>
</compile_context>

<pallas_src>
from functools import partial

import jax
import jax.numpy as jnp
from jax.experimental import pallas as pl
from jax.experimental.pallas import tpu as pltpu


# ----------------------------------------------------------------------------
# Tile selection: byte-budgeted, generation-safe.
# ----------------------------------------------------------------------------
_SUBLANE = 8
_LANE = 128
# Total bytes of double-buffered *input* streams per grid step.  Fits well
# inside v5e's 16 MiB scoped default and leaves headroom on v7x (64 MiB phys).
_VMEM_INPUT_BUDGET = 12 * 1024 * 1024


def _cdiv(a, b):
    return -(-a // b)


def _round_up(x, m):
    return ((x + m - 1) // m) * m


def _pick_tiles(B, N, itemsize_sum):
    """Return (block_b, num_b, block_n, num_n)."""

    def blk_bytes(bb, bn):
        # double-buffered input streams (output block is negligible)
        return 2 * bb * bn * itemsize_sum

    # --- feature-axis tile ----------------------------------------------
    if blk_bytes(_SUBLANE, N) <= _VMEM_INPUT_BUDGET:
        block_n = N
    else:
        block_n = None
        bn = (N // _LANE) * _LANE
        while bn >= _LANE:
            if N % bn == 0 and blk_bytes(_SUBLANE, bn) <= _VMEM_INPUT_BUDGET:
                block_n = bn
                break
            bn -= _LANE
        if block_n is None:
            # TODO(synk): huge N with no 128-multiple divisor would need a
            # masked tail tile along N; fall back to a single full-N block.
            block_n = N
    num_n = 1 if block_n == N else N // block_n

    # --- batch-axis tile --------------------------------------------------
    per_row = 2 * block_n * itemsize_sum
    cap = max(_SUBLANE, (_VMEM_INPUT_BUDGET // per_row) // _SUBLANE * _SUBLANE)
    num_b = max(1, _cdiv(B, cap))
    if B >= 2 * _SUBLANE and num_b == 1:
        num_b = 2  # keep both v7x TensorCores busy even for small B
    block_b = _round_up(_cdiv(B, num_b), _SUBLANE)
    return block_b, num_b, block_n, num_n


# ----------------------------------------------------------------------------
# Kernels.  Grid = (batch_blocks, feature_blocks); output block (block_b, 1)
# is resident across the feature ("arbitrary") axis and acts as accumulator.
# ----------------------------------------------------------------------------
def _to_f32(v):
    if jnp.issubdtype(v.dtype, jnp.integer):
        # two-step int -> f32 (sign-extend then convert) is maximally portable
        return v.astype(jnp.int32).astype(jnp.float32)
    return v.astype(jnp.float32)


def _bce_body(x_ref, y_ref, m_ref, o_ref, *, inv_n):
    k = pl.program_id(1)

    x = _to_f32(x_ref[...])
    y = _to_f32(y_ref[...])
    # Numerically stable binary_cross_entropy_with_logits, reduction='none':
    #   l = max(x, 0) - x*y + log1p(exp(-|x|))
    loss = jnp.maximum(x, 0.0) - x * y + jnp.log1p(jnp.exp(-jnp.abs(x)))
    if m_ref is not None:
        loss = loss * _to_f32(m_ref[...])          # weight = mask
    psum = jnp.sum(loss, axis=1, keepdims=True)    # (block_b, 1) f32

    @pl.when(k == 0)
    def _():
        o_ref[...] = jnp.zeros_like(o_ref)

    o_ref[...] = o_ref[...] + psum

    @pl.when(k == pl.num_programs(1) - 1)
    def _():
        o_ref[...] = o_ref[...] * inv_n            # mean over full N


def _bce_kernel_masked(x_ref, y_ref, m_ref, o_ref, *, inv_n):
    _bce_body(x_ref, y_ref, m_ref, o_ref, inv_n=inv_n)


def _bce_kernel_nomask(x_ref, y_ref, o_ref, *, inv_n):
    _bce_body(x_ref, y_ref, None, o_ref, inv_n=inv_n)


# ----------------------------------------------------------------------------
# Wrapper: mirrors SigmoidBCELoss.forward(inputs, targets, mask=None) -> (B,)
# ----------------------------------------------------------------------------
def sigmoid_bce_loss(inputs, targets, mask=None):
    B, N = inputs.shape

    # Pass operands in their *native* dtypes (bool widened to int8 only).
    x = inputs
    y = targets.astype(jnp.int8) if targets.dtype == jnp.bool_ else targets
    m = None
    if mask is not None:
        m = mask.astype(jnp.int8) if mask.dtype == jnp.bool_ else mask

    itemsize_sum = x.dtype.itemsize + y.dtype.itemsize + (
        m.dtype.itemsize if m is not None else 0)
    block_b, num_b, block_n, num_n = _pick_tiles(B, N, itemsize_sum)

    # Pad the batch to a whole number of tiles (padded rows sliced off below).
    Bp = block_b * num_b
    if Bp != B:
        pad = ((0, Bp - B), (0, 0))
        x = jnp.pad(x, pad)
        y = jnp.pad(y, pad)
        if m is not None:
            m = jnp.pad(m, pad)

    inv_n = 1.0 / float(N)
    in_spec = pl.BlockSpec((block_b, block_n), lambda i, k: (i, k))
    out_spec = pl.BlockSpec((block_b, 1), lambda i, k: (i, 0))
    cparams = pltpu.CompilerParams(
        dimension_semantics=("parallel", "arbitrary"),
        vmem_limit_bytes=32 * 1024 * 1024,  # safe on v5e/v6e/v7x
    )

    if m is not None:
        kernel = partial(_bce_kernel_masked, inv_n=inv_n)
        operands = (x, y, m)
    else:
        kernel = partial(_bce_kernel_nomask, inv_n=inv_n)
        operands = (x, y)

    out = pl.pallas_call(
        kernel,
        out_shape=jax.ShapeDtypeStruct((Bp, 1), jnp.float32),
        grid_spec=pltpu.PrefetchScalarGridSpec(
            num_scalar_prefetch=0,
            grid=(num_b, num_n),
            in_specs=[in_spec] * len(operands),
            out_specs=out_spec,
        ),
        compiler_params=cparams,
    )(*operands)

    return out[:B, 0]


# ----------------------------------------------------------------------------
# Pure-JAX reference (torch BCEWithLogits(reduction='none').mean(dim=1)).
# ----------------------------------------------------------------------------
def _sigmoid_bce_ref(inputs, targets, mask=None):
    x = inputs.astype(jnp.float32)
    y = targets.astype(jnp.float32)
    loss = jnp.maximum(x, 0.0) - x * y + jnp.log1p(jnp.exp(-jnp.abs(x)))
    if mask is not None:
        loss = loss * mask.astype(jnp.float32)
    return loss.mean(axis=1)


if __name__ == "__main__":
    # word2vec-ish small shapes: batch of centers, N = contexts + negatives.
    B, N = 64, 60

    key = jax.random.PRNGKey(0)
    k_x, k_y, k_m = jax.random.split(key, 3)

    # Narrow native dtypes: bf16 logits, int8 labels, int8 mask.
    inputs = (jax.random.normal(k_x, (B, N)) * 2.0).astype(jnp.bfloat16)
    targets = jax.random.bernoulli(k_y, 0.5, (B, N)).astype(jnp.int8)
    mask = jax.random.bernoulli(k_m, 0.7, (B, N)).astype(jnp.int8)

    # Masked path (weight=mask).
    out_masked = jax.block_until_ready(sigmoid_bce_loss(inputs, targets, mask))
    ref_masked = _sigmoid_bce_ref(inputs, targets, mask)
    assert out_masked.shape == (B,)
    assert jnp.allclose(out_masked, ref_masked, rtol=1e-4, atol=1e-5)

    # mask=None path (weight omitted).
    out_plain = jax.block_until_ready(sigmoid_bce_loss(inputs, targets, None))
    ref_plain = _sigmoid_bce_ref(inputs, targets, None)
    assert out_plain.shape == (B,)
    assert jnp.allclose(out_plain, ref_plain, rtol=1e-4, atol=1e-5)

    print("KERNEL_OK")
</pallas_src>

<mosaic_0001>
module attributes {stable_mosaic.version = 11 : i64} {
  func.func @_bce_kernel_masked(%arg0: i32, %arg1: i32, %arg2: memref<32x60xbf16, #tpu.memory_space<vmem>>, %arg3: memref<32x60xi8, #tpu.memory_space<vmem>>, %arg4: memref<32x60xi8, #tpu.memory_space<vmem>>, %arg5: memref<32x1xf32, #tpu.memory_space<vmem>>) attributes {dimension_semantics = [#tpu.dimension_semantics<parallel>, #tpu.dimension_semantics<arbitrary>], iteration_bounds = array<i64: 2, 1>, scalar_prefetch = 0 : i64, scratch_operands = 0 : i64, tpu.core_type = #tpu.core_type<tc>, window_params = [{transform_indices = @transform_0, window_bounds = array<i64: 32, 60>}, {transform_indices = @transform_1, window_bounds = array<i64: 32, 60>}, {transform_indices = @transform_2, window_bounds = array<i64: 32, 60>}, {transform_indices = @transform_3, window_bounds = array<i64: 32, 1>}]} {
    %c0 = arith.constant 0 : index
    %c0_0 = arith.constant 0 : index
    %0 = vector.load %arg2[%c0, %c0_0] : memref<32x60xbf16, #tpu.memory_space<vmem>>, vector<32x60xbf16>
    %1 = arith.extf %0 : vector<32x60xbf16> to vector<32x60xf32>
    %c0_1 = arith.constant 0 : index
    %c0_2 = arith.constant 0 : index
    %2 = vector.load %arg3[%c0_1, %c0_2] : memref<32x60xi8, #tpu.memory_space<vmem>>, vector<32x60xi8>
    %3 = arith.extsi %2 : vector<32x60xi8> to vector<32x60xi32>
    %4 = arith.sitofp %3 : vector<32x60xi32> to vector<32x60xf32>
    %cst = arith.constant 0.000000e+00 : f32
    %5 = vector.broadcast %cst : f32 to vector<32x60xf32>
    %6 = arith.maximumf %1, %5 : vector<32x60xf32>
    %7 = arith.mulf %1, %4 : vector<32x60xf32>
    %8 = arith.subf %6, %7 : vector<32x60xf32>
    %9 = math.absf %1 : vector<32x60xf32>
    %cst_3 = arith.constant 0.000000e+00 : f32
    %10 = vector.broadcast %cst_3 : f32 to vector<32x60xf32>
    %11 = arith.subf %10, %9 : vector<32x60xf32>
    %12 = math.exp %11 : vector<32x60xf32>
    %13 = math.log1p %12 : vector<32x60xf32>
    %14 = arith.addf %8, %13 : vector<32x60xf32>
    %c0_4 = arith.constant 0 : index
    %c0_5 = arith.constant 0 : index
    %15 = vector.load %arg4[%c0_4, %c0_5] : memref<32x60xi8, #tpu.memory_space<vmem>>, vector<32x60xi8>
    %16 = arith.extsi %15 : vector<32x60xi8> to vector<32x60xi32>
    %17 = arith.sitofp %16 : vector<32x60xi32> to vector<32x60xf32>
    %18 = arith.mulf %14, %17 : vector<32x60xf32>
    %cst_6 = arith.constant dense<0.000000e+00> : vector<32xf32>
    %19 = vector.multi_reduction <add>, %18, %cst_6 [1] : vector<32x60xf32> to vector<32xf32>
    %20 = vector.shape_cast %19 : vector<32xf32> to vector<32x1xf32>
    %c0_i32 = arith.constant 0 : i32
    %21 = arith.cmpi eq, %arg1, %c0_i32 : i32
    %22 = arith.extui %21 : i1 to i32
    %c0_i32_7 = arith.constant 0 : i32
    %23 = arith.cmpi ne, %22, %c0_i32_7 : i32
    scf.if %23 {
      %cst_14 = arith.constant 0.000000e+00 : f32
      %30 = vector.broadcast %cst_14 : f32 to vector<32x1xf32>
      %c0_15 = arith.constant 0 : index
      %c0_16 = arith.constant 0 : index
      %31 = vector.load %arg5[%c0_15, %c0_16] : memref<32x1xf32, #tpu.memory_space<vmem>>, vector<32x1xf32>
      tpu.vector_store %arg5[%c0_15, %c0_16], %30 {strides = array<i32>} : memref<32x1xf32, #tpu.memory_space<vmem>>, vector<32x1xf32>,
    } else {
    }
    %c0_8 = arith.constant 0 : index
    %c0_9 = arith.constant 0 : index
    %24 = vector.load %arg5[%c0_8, %c0_9] : memref<32x1xf32, #tpu.memory_space<vmem>>, vector<32x1xf32>
    %25 = arith.addf %24, %20 : vector<32x1xf32>
    %c0_10 = arith.constant 0 : index
    %c0_11 = arith.constant 0 : index
    %26 = vector.load %arg5[%c0_10, %c0_11] : memref<32x1xf32, #tpu.memory_space<vmem>>, vector<32x1xf32>
    tpu.vector_store %arg5[%c0_10, %c0_11], %25 {strides = array<i32>} : memref<32x1xf32, #tpu.memory_space<vmem>>, vector<32x1xf32>,
    %c0_i32_12 = arith.constant 0 : i32
    %27 = arith.cmpi eq, %arg1, %c0_i32_12 : i32
    %28 = arith.extui %27 : i1 to i32
    %c0_i32_13 = arith.constant 0 : i32
    %29 = arith.cmpi ne, %28, %c0_i32_13 : i32
    scf.if %29 {
      %c0_14 = arith.constant 0 : index
      %c0_15 = arith.constant 0 : index
      %30 = vector.load %arg5[%c0_14, %c0_15] : memref<32x1xf32, #tpu.memory_space<vmem>>, vector<32x1xf32>
      %cst_16 = arith.constant 0.0166666675 : f32
      %31 = vector.broadcast %cst_16 : f32 to vector<32x1xf32>
      %32 = arith.mulf %30, %31 : vector<32x1xf32>
      %c0_17 = arith.constant 0 : index
      %c0_18 = arith.constant 0 : index
      %33 = vector.load %arg5[%c0_17, %c0_18] : memref<32x1xf32, #tpu.memory_space<vmem>>, vector<32x1xf32>
      tpu.vector_store %arg5[%c0_17, %c0_18], %32 {strides = array<i32>} : memref<32x1xf32, #tpu.memory_space<vmem>>, vector<32x1xf32>,
    } else {
    }
    return
  }
  func.func @transform_0(%arg0: i32, %arg1: i32) -> (i32, i32) {
    %c0_i32 = arith.constant 0 : i32
    return %arg0, %arg1 : i32, i32
  }
  func.func @transform_1(%arg0: i32, %arg1: i32) -> (i32, i32) {
    %c0_i32 = arith.constant 0 : i32
    return %arg0, %arg1 : i32, i32
  }
  func.func @transform_2(%arg0: i32, %arg1: i32) -> (i32, i32) {
    %c0_i32 = arith.constant 0 : i32
    return %arg0, %arg1 : i32, i32
  }
  func.func @transform_3(%arg0: i32, %arg1: i32) -> (i32, i32) {
    %c0_i32 = arith.constant 0 : i32
    %c0_i32_0 = arith.constant 0 : i32
    return %arg0, %c0_i32 : i32, i32
  }
}

</mosaic_0001>

<bundles_post_ra>
// kernel: tpu_custom_call.1
= control target key start
LH: loop header
LB: loop body
LE: loop exit
PB: predicated region body
PF: predicated region fallthrough
CT: control target
= control target key end

     0   :  { %8 = vsyncpa [#allocation3], 0  ;;  %s1129_s0 = inlined_call_operand.hbm [shape: bf16[64,60], index: 0, kind: input, shape index: {}]   ;;  %s1130_s1 = inlined_call_operand.hbm [shape: s8[64,60], index: 1, kind: input, shape index: {}]   ;;  %s1131_s2 = inlined_call_operand.hbm [shape: s8[64,60], index: 2, kind: input, shape index: {}]   ;;  %s1132_s3 = inlined_call_operand.vmem [shape: f32[64,1], index: 3, kind: output, shape index: {}]  }
   0x1   :  { %10 = vsyncpa [#allocation3 + $0x1], 0 }
   0x2   :  { %11 = vsyncpa [#allocation5], 0 }
   0x3   :  { %13 = vsyncpa [#allocation5 + $0x1], 0  ;;  %s841_s12 = smov 0   ;;  %s843_s13 = smov 0  }
   0x4   :  { %s845_s14 = smov 0   ;;  %s847_s15 = smov 0  }
   0x5   :  { %s849_s16 = smov 0   ;;  %s851_s17 = smov 0  }
   0x6 LB: > { %s1134_s18 = sadd.s32 4294967295, %s813_s17   ;;  %s31_s19 = sadd.s32 1, %s809_s16  ;;  %s813_s17 = sphi %s851_s17, %s19_s17   ;;  %s809_s16 = sphi %s849_s16, %s1150_s16   ;;  %s805_s15 = sphi %s847_s15, %s1149_s15   ;;  %s801_s14 = sphi %s845_s14, %s1148_s14   ;;  %s797_s13 = sphi %s843_s13, %s1147_s13   ;;  %s793_s12 = sphi %s841_s12, %s1146_s12  }
   0x7   : > { %p33_p0 = scmp.ge.s32.totalorder %s31_s19, 2  ;;  %s40_s20 = sadd.s32 1, %s801_s14 }
   0x8   : > { %p47_p1 = scmp.ne.s32.totalorder %s801_s14, %s797_s13  ;;  %p48_p2 = scmp.eq.s32.totalorder %s813_s17, 0 }
   0x9   : > { %s1152_s19 = smov (%p33_p0, %s31_s19), 0  ;;  %p53_p4 = scmp.ne.s32.totalorder %s797_s13, %s793_s12 }
   0xa   : > { %p49_p3 = por %p48_p2, %p47_p1  ;;  %s35_s21 = ssub.s32 %s809_s16, %s1152_s19 }
   0xb   : > { %p54_p5 = scmp.eq.s32.totalorder %s1134_s18, 0  ;;  %p38_p6 = scmp.eq.s32.totalorder %s35_s21, 0 }
   0xc   : > { %p601_p8 = scmp.lt.s32.totalorder %s813_s17, 2  ;;  %s891_s24 = sand.u32 1, %s801_s14  }
   0xd   : > { %p882_p7 = por %p54_p5, %p53_p4  ;;  %s181_s26 = sand.u32 1, %s813_s17  }
   0xe   : > { %s888_s23 = scalar_select %p38_p6, %s801_s14, %s40_s20  }
   0xf   : > { %s1136_s22 = scalar_select %p882_p7, 1, 0 }
  0x10   : > { %p893_p9 = pnand %p601_p8, %p49_p3  ;;  %s563_s27 = sshll.u32 %s891_s24, 3 }
  0x11   : > { %s564_s28 = sshll.u32 %s809_s16, 7  ;;  %s185_s5 = scalar_lea.vmem [#allocation4], %s563_s27 }
  0x12   : > { %s1137_s25 = scalar_select %p893_p9, 1, 0 }
  0x13   : > { %s905_s4 = scalar_lea.hbm %s1130_s1, %s564_s28  ;;  %s193_s6 = sshll.u32 %s185_s5, 4  ;;  %s909_s6 = int_to_ptr.vmem [resolvable:$true] %s193_s6 }
  0x14   : > { %s911_s7 = scalar_lea.sflag [#allocation5], %s181_s26  ;;  %s669_s8 = scalar_lea.hbm %s905_s4, 128 }
  0x15   : > { %p670_p10 = scmp.ne.s32.totalorder %s905_s4, %s669_s8  ;;  %p917_p11 = pneg %p893_p9 }
  0x16   : > { %s674_s12 = scalar_lea.hbm %s1130_s1, 256  ;;  %p675_p0 = scmp.lt.u32.totalorder %s905_s4, %s1130_s1 }
  0x17   : > { %p672_p12 = pnand %p917_p11, %p670_p10  ;;  %p676_p1 = scmp.lt.u32.totalorder %s674_s12, %s669_s8 }
  0x18   : > { %p678_p3 = scmp.lt.u32.totalorder %s669_s8, %s905_s4 }
  0x19   : > { %p673_p13 = pneg %p672_p12  ;;  %p677_p2 = por %p676_p1, %p675_p0 }
  0x1b   : > { %p679_p4 = por %p678_p3, %p677_p2 }
  0x1d   : > { %p680_p5 = pnand %p679_p4, %p673_p13 }
  0x1f   : > { %683 = shalt.err (!%p680_p5)
}
  0x20   : > { %s684_s26 = scalar_lea.vmem %s909_s6, 128  ;;  %s815_s29 = smov [#allocation4]  }
  0x21   : > { %p685_p6 = scmp.ne.s32.totalorder %s909_s6, %s684_s26  ;;  %s689_s30 = sshll.u32 %s815_s29, 4  ;;  %s690_s30 = int_to_ptr.vmem [resolvable:$false] %s689_s30 }
  0x22   : > { %s691_s5 = scalar_lea.vmem %s690_s30, 256  ;;  %p692_p12 = scmp.lt.s32.totalorder %s909_s6, %s690_s30 }
  0x23   : > { %p687_p8 = pnand %p685_p6, %p917_p11  ;;  %p693_p7 = scmp.lt.s32.totalorder %s691_s5, %s684_s26 }
  0x25   : > { %p688_p10 = pneg %p687_p8  ;;  %p694_p0 = por %p693_p7, %p692_p12 }
  0x27   : > { %p695_p1 = pnand %p694_p0, %p688_p10 }
  0x29   : > { %698 = shalt.err (!%p695_p1)
}
  0x2a   : > { %597 = dma.hbm_to_vmem [thread:$0]  (!%p893_p9), %s905_s4, 128, %s909_s6, %s911_s7  }
  0x2b   : > { %s946_s11 = scalar_lea.hbm %s1131_s2, %s564_s28  ;;  %p567_p7 = scmp.ge.s32.totalorder %s813_s17, 1 }
  0x2c   : > { %p217_p13 = scmp.lt.s32.totalorder %s813_s17, 3  ;;  %s560_s20 = sshll.u32 %s891_s24, 4 }
  0x2d   : > { %s575_s21 = sshll.u32 %s809_s16, 8  ;;  %s163_s4 = scalar_lea.vmem [#allocation2], %s560_s20 }
  0x2e   : > { %p950_p2 = pnand %p567_p7, %p217_p13  ;;  %s959_s30 = scalar_lea.hbm %s1129_s0, %s575_s21 }
  0x2f   : > { %s171_s28 = sshll.u32 %s163_s4, 4  ;;  %s965_s6 = scalar_lea.vmem [#allocation6], %s563_s27  ;;  %s961_s28 = int_to_ptr.vmem [resolvable:$true] %s171_s28 }
  0x30   : > { %s1139_s12 = scalar_select %p950_p2, 1, 0 }
  0x31   : > { %s212_s5 = sshll.u32 %s965_s6, 4  ;;  %s160_s8 = scalar_lea.sflag [#allocation3], %s891_s24  ;;  %s213_s5 = int_to_ptr.vmem [resolvable:$true] %s212_s5 }
  0x32   : > { %s699_s10 = scalar_lea.hbm %s959_s30, 256  ;;  %s704_s29 = scalar_lea.hbm %s1129_s0, 512 }
  0x33   : > { %p700_p3 = scmp.ne.s32.totalorder %s959_s30, %s699_s10  ;;  %p705_p6 = scmp.lt.u32.totalorder %s959_s30, %s1129_s0 }
  0x34   : > { %p706_p8 = scmp.lt.u32.totalorder %s704_s29, %s699_s10  ;;  %p708_p12 = scmp.lt.u32.totalorder %s699_s10, %s959_s30 }
  0x35   : > { %p702_p4 = pnand %p700_p3, %p917_p11 }
  0x36   : > { %p707_p10 = por %p706_p8, %p705_p6 }
  0x37   : > { %p703_p5 = pneg %p702_p4 }
  0x38   : > { %p709_p0 = por %p708_p12, %p707_p10 }
  0x3a   : > { %p710_p1 = pnand %p709_p0, %p703_p5 }
  0x3c   : > { %713 = shalt.err (!%p710_p1)
}
  0x3d   : > { %s714_s27 = scalar_lea.vmem %s961_s28, 256  ;;  %s816_s4 = smov [#allocation2]  }
  0x3e   : > { %p715_p7 = scmp.ne.s32.totalorder %s961_s28, %s714_s27  ;;  %s719_s21 = sshll.u32 %s816_s4, 4  ;;  %s720_s21 = int_to_ptr.vmem [resolvable:$false] %s719_s21 }
  0x3f   : > { %s721_s18 = scalar_lea.vmem %s720_s21, 512  ;;  %p722_p4 = scmp.lt.s32.totalorder %s961_s28, %s720_s21 }
  0x40   : > { %p717_p13 = pnand %p715_p7, %p917_p11  ;;  %p723_p2 = scmp.lt.s32.totalorder %s721_s18, %s714_s27 }
  0x42   : > { %p718_p3 = pneg %p717_p13  ;;  %p724_p6 = por %p723_p2, %p722_p4 }
  0x44   : > { %p725_p8 = pnand %p724_p6, %p718_p3 }
  0x46   : > { %728 = shalt.err (!%p725_p8)
}
  0x47   : > { %s817_s10 = smov 64   ;;  %s818_s26 = smov 4  }
  0x48   : > { %594 = dma.hbm_to_vmem [thread:$0]  (!%p893_p9), %s959_s30, 256, %s961_s28, %s160_s8, %s817_s10, %s817_s10, %s818_s26  }
  0x49   : > { %s729_s29 = scalar_lea.hbm %s946_s11, 128  ;;  %s734_s4 = scalar_lea.hbm %s1131_s2, 256 }
  0x4a   : > { %p730_p2 = scmp.ne.s32.totalorder %s946_s11, %s729_s29  ;;  %p735_p12 = scmp.lt.u32.totalorder %s946_s11, %s1131_s2 }
  0x4b   : > { %p736_p0 = scmp.lt.u32.totalorder %s734_s4, %s729_s29  ;;  %p738_p7 = scmp.lt.u32.totalorder %s729_s29, %s946_s11 }
  0x4c   : > { %p732_p5 = pnand %p730_p2, %p917_p11 }
  0x4d   : > { %p737_p1 = por %p736_p0, %p735_p12 }
  0x4e   : > { %p733_p10 = pneg %p732_p5 }
  0x4f   : > { %p739_p13 = por %p738_p7, %p737_p1 }
  0x51   : > { %p740_p3 = pnand %p739_p13, %p733_p10 }
  0x53   : > { %743 = shalt.err (!%p740_p3)
}
  0x54   : > { %s744_s24 = scalar_lea.vmem %s213_s5, 128  ;;  %s819_s30 = smov [#allocation6]  }
  0x55   : > { %p745_p4 = scmp.ne.s32.totalorder %s213_s5, %s744_s24  ;;  %s749_s28 = sshll.u32 %s819_s30, 4  ;;  %s750_s28 = int_to_ptr.vmem [resolvable:$false] %s749_s28 }
  0x56   : > { %s751_s6 = scalar_lea.vmem %s750_s28, 256  ;;  %p752_p2 = scmp.lt.s32.totalorder %s213_s5, %s750_s28 }
  0x57   : > { %p747_p6 = pnand %p745_p4, %p917_p11  ;;  %p753_p5 = scmp.lt.s32.totalorder %s751_s6, %s744_s24 }
  0x59   : > { %p748_p8 = pneg %p747_p6  ;;  %p754_p9 = por %p753_p5, %p752_p2 }
  0x5b   : > { %p755_p0 = pnand %p754_p9, %p748_p8 }
  0x5d   : > { %758 = shalt.err (!%p755_p0)
}
  0x5e   : > { %p1140_p12 = scmp.ne.s32.totalorder %s1137_s25, 0  ;;  %p1141_p10 = scmp.ne.s32.totalorder %s1139_s12, 0 }
  0x5f   : > { %s1015_s9 = sand.u32 (!%p1141_p10), 1, %s797_s13   ;;  %p1142_p11 = scmp.ne.s32.totalorder (!%p1141_p10), %s1136_s22, 0 }
  0x60   : > { %600 = dma.hbm_to_vmem [thread:$0]  (!%p1140_p12), %s946_s11, 128, %s213_s5, %s911_s7  }
  0x61   : > { %221 = sbr.rel (%p1141_p10) target bundleno = 310 (0x136), region = 32  ;;  %s568_s8 = sshll.u32 (!%p1141_p10), %s1015_s9, 4 }
  0x62   : > { %s224_s10 = scalar_lea.sflag (!%p1141_p10), [#allocation3], %s1015_s9  ;;  %s227_s26 = scalar_lea.vmem (!%p1141_p10), [#allocation2], %s568_s8 }
  0x68   : > { %784 = dma.done.wait (%p1142_p11), %s224_s10, 256  }
  0x69   : > { %786 = vsyncadd (%p1142_p11), %s224_s10, 4294967040  ;;  %s1143_s25 = sadd.s32 4294967295, %s813_s17   ;;  %s569_s11 = sshll.u32 %s1015_s9, 3 }
  0x6a   : > { %s232_s7 = sand.u32 1, %s1143_s25   ;;  %s1028_s5 = scalar_lea.vmem [#allocation4], %s569_s11 }
  0x6b   : > { %s233_s12 = scalar_lea.sflag [#allocation5], %s232_s7 }
  0x6c   : > { %788 = dma.done.wait (%p1142_p11), %s233_s12, 256  }
  0x6d   : > { %790 = vsyncadd (%p1142_p11), %s233_s12, 4294967040  ;;  %s571_s29 = sshll.u32 %s805_s15, 2  ;;  %vm400_vm0 = vcmask 7168   ;;  %v577_v0 = vld [vmem:[%s227_s26] sm:$0xff]   ;;  %v820_v1 = vmov 0.0   ;;  %v584_v3 = vld [vmem:[%s227_s26 + $0x8] sm:$0xff]  }
  0x6e   : > { %p280_p9 = scmp.lt.s32.totalorder %s571_s29, 7  ;;  %v1042_v2 = vunpack.c.l.bf16 %v577_v0  ;;  %v1046_v4 = vunpack.c.l.bf16 %v584_v3  ;;  %v1048_v5 = vunpack.c.h.bf16 %v577_v0  ;;  %v1057_v12 = vunpack.c.h.bf16 %v584_v3  ;;  %v293_v19 = vld [vmem:[%s1028_s5] sm:$0xff]  ;;  %s245_s15 = scalar_lea.vmem [#allocation6], %s569_s11 }
  0x6f   : > { %v294_v22 = vunpack.c.0.s8 %v293_v19  ;;  %v296_v24 = vunpack.c.2.s8 %v293_v19  ;;  %v295_v26 = vunpack.c.1.s8 %v293_v19  ;;  %v1063_v29 = vld [vmem:[%s245_s15] sm:$0xff]  ;;  %v297_v42 = vunpack.c.3.s8 %v293_v19 }
  0x70   : > { %s1154_s29 = smov (!%p280_p9, %s571_s29), 7  ;;  %v314_v6 = vand.u32 2147483647, %v1042_v2  ;;  %v316_v7 = vand.u32 2147483647, %v1046_v4  ;;  %v302_v36 = vmax.f32 %v1042_v2, 0.0  ;;  %v371_v37 = vunpack.c.0.s8 %v1063_v29 }
  0x71   : > { %s572_s20 = sshll.u32 %s1154_s29, 3  ;;  %v315_v10 = vand.u32 2147483647, %v1048_v5  ;;  %v317_v16 = vand.u32 2147483647, %v1057_v12  ;;  %v298_v31 = vcvt.s32.f32 %v294_v22  ;;  %v300_v33 = vcvt.s32.f32 %v296_v24 }
  0x72   : > { %s1038_s21 = scalar_lea.vmem %s1132_s3, %s572_s20  ;;  %v318_v8 = vsub.f32 0.0, %v314_v6  ;;  %v320_v9 = vsub.f32 0.0, %v316_v7  ;;  %v299_v34 = vcvt.s32.f32 %v295_v26  ;;  %v373_v38 = vunpack.c.2.s8 %v1063_v29 }
  0x73   : > { %401 = vst.msk [vmem:[%s1038_s21] sm:$0xff] %vm400_vm0, %v820_v1  ;;  %402 = vst.msk [vmem:[%s1038_s21 + $0x8] sm:$0xff] %vm400_vm0, %v820_v1  ;;  %v319_v14 = vsub.f32 0.0, %v315_v10  ;;  %v321_v17 = vsub.f32 0.0, %v317_v16  ;;  %v304_v41 = vmax.f32 %v1046_v4, 0.0  ;;  %v306_v44 = vmul.f32 %v1042_v2, %v298_v31 }
  0x74   : > { %403 = vst.msk [vmem:[%s1038_s21 + $0x10] sm:$0xff] %vm400_vm0, %v820_v1  ;;  %404 = vst.msk [vmem:[%s1038_s21 + $0x18] sm:$0xff] %vm400_vm0, %v820_v1  ;;  %v322_v11 = vmul.f32 1.442695, %v318_v8  ;;  %v326_v13 = vmul.f32 1.442695, %v320_v9  ;;  %v308_v48 = vmul.f32 %v1046_v4, %v300_v33  ;;  %v307_v50 = vmul.f32 %v1048_v5, %v299_v34 }
  0x75   : > { %v324_v15 = vmul.f32 1.442695, %v319_v14  ;;  %v328_v18 = vmul.f32 1.442695, %v321_v17  ;;  %v303_v47 = vmax.f32 %v1048_v5, 0.0  ;;  %v375_v51 = vcvt.s32.f32 %v371_v37 }
  0x76   : > { %653 = vpow2.f32 %v322_v11  ;;  %v377_v55 = vcvt.s32.f32 %v373_v38  ;;  %v301_v57 = vcvt.s32.f32 %v297_v42  ;;  %v310_v59 = vsub.f32 %v302_v36, %v306_v44 }
  0x77   : > { %655 = vpow2.f32 %v326_v13  ;;  %v372_v62 = vunpack.c.1.s8 %v1063_v29  ;;  %v312_v1 = vsub.f32 %v304_v41, %v308_v48  ;;  %v311_v2 = vsub.f32 %v303_v47, %v307_v50 }
  0x78   : > { %657 = vpow2.f32 %v324_v15  ;;  %v305_v5 = vmax.f32 %v1057_v12, 0.0  ;;  %v309_v9 = vmul.f32 %v1057_v12, %v301_v57  ;;  %vm383_vm4 = vcmask 490496  }
  0x79   : > { %659 = vpow2.f32 %v328_v18  ;;  %v376_v16 = vcvt.s32.f32 %v372_v62  ;;  %v374_v17 = vunpack.c.3.s8 %v1063_v29 }
  0x7a   : > { %v313_v24 = vsub.f32 %v305_v5, %v309_v9  ;;  %v405_v34 = vld [vmem:[%s1038_s21] sm:$0xff]  ;;  %v406_v37 = vld [vmem:[%s1038_s21 + $0x8] sm:$0xff] }
  0x7b   : > { %v407_v36 = vld [vmem:[%s1038_s21 + $0x10] sm:$0xff]  ;;  %v408_v38 = vld [vmem:[%s1038_s21 + $0x18] sm:$0xff] }
  0x80   : > { %v654_v20 = vpop.eup %653 }
  0x81   : > { %v656_v21 = vpop.eup %655  ;;  %v330_v23 = vadd.f32 1.0, %v654_v20  ;;  %v333_v28 = vmul.f32 -0.5, %v654_v20  ;;  %v336_v45 = vand.u32 2147483647, %v654_v20 }
  0x82   : > { %v348_v25 = vadd.f32 1.0, %v656_v21  ;;  %v658_v27 = vpop.eup %657  ;;  %v351_v32 = vmul.f32 -0.5, %v656_v21  ;;  %v354_v49 = vand.u32 2147483647, %v656_v21 }
  0x83   : > { %661 = vlog2.f32 %v330_v23  ;;  %v339_v30 = vadd.f32 1.0, %v658_v27  ;;  %v660_v35 = vpop.eup %659  ;;  %v342_v39 = vmul.f32 -0.5, %v658_v27  ;;  %v334_v40 = vadd.f32 1.0, %v333_v28 }
  0x84   : > { %663 = vlog2.f32 %v348_v25  ;;  %v357_v43 = vadd.f32 1.0, %v660_v35  ;;  %v352_v46 = vadd.f32 1.0, %v351_v32  ;;  %v360_v53 = vmul.f32 -0.5, %v660_v35 }
  0x85   : > { %665 = vlog2.f32 %v339_v30  ;;  %v343_v52 = vadd.f32 1.0, %v342_v39  ;;  %v335_v54 = vmul.f32 %v654_v20, %v334_v40  ;;  %v345_v56 = vand.u32 2147483647, %v658_v27 }
  0x86   : > { %667 = vlog2.f32 %v357_v43  ;;  %vm1073_vm1 = vcmp.lt.f32.partialorder %v336_v45, 0.0004427343  ;;  %v353_v61 = vmul.f32 %v656_v21, %v352_v46  ;;  %vm355_vm2 = vcmp.lt.f32.partialorder %v354_v49, 0.0004427343 }
  0x87   : > { %v344_v4 = vmul.f32 %v658_v27, %v343_v52  ;;  %v361_v6 = vadd.f32 1.0, %v360_v53  ;;  %vm346_vm3 = vcmp.lt.f32.partialorder %v345_v56, 0.0004427343  ;;  %v363_v10 = vand.u32 2147483647, %v660_v35 }
  0x88   : > { %v378_v28 = vcvt.s32.f32 %v374_v17 }
  0x89   : > { %v362_v20 = vmul.f32 %v660_v35, %v361_v6  ;;  %vm364_vm5 = vcmp.lt.f32.partialorder %v363_v10, 0.0004427343 }
  0x8d   : > { %v662_v58 = vpop.eup %661 }
  0x8e   : > { %v664_v63 = vpop.eup %663  ;;  %v332_v0 = vmul.f32 0.6931472, %v662_v58 }
  0x8f   : > { %v350_v3 = vmul.f32 0.6931472, %v664_v63  ;;  %v666_v7 = vpop.eup %665 }
  0x90   : > { %v338_v8 = vsel %vm1073_vm1, %v335_v54, %v332_v0  ;;  %v341_v14 = vmul.f32 0.6931472, %v666_v7  ;;  %v668_v21 = vpop.eup %667 }
  0x91   : > { %v366_v11 = vadd.f32 %v338_v8, %v310_v59  ;;  %v356_v13 = vsel %vm355_vm2, %v353_v61, %v350_v3  ;;  %v359_v25 = vmul.f32 0.6931472, %v668_v21 }
  0x92   : > { %v368_v15 = vadd.f32 %v356_v13, %v312_v1  ;;  %v347_v19 = vsel %vm346_vm3, %v344_v4, %v341_v14 }
  0x93   : > { %v379_v18 = vmul.f32 %v375_v51, %v366_v11  ;;  %v367_v23 = vadd.f32 %v347_v19, %v311_v2  ;;  %v365_v29 = vsel %vm364_vm5, %v362_v20, %v359_v25 }
  0x94   : > { %v381_v22 = vmul.f32 %v377_v55, %v368_v15  ;;  %v369_v31 = vadd.f32 %v365_v29, %v313_v24 }
  0x95   : > { %v384_v12 = vsel %vm383_vm4, %v379_v18, 0.0  ;;  %v380_v27 = vmul.f32 %v376_v16, %v367_v23 }
  0x96   : > { %385 = vadd.xlane.f32.xlu0 %v384_v12  ;;  %v390_v26 = vsel %vm383_vm4, %v381_v22, 0.0  ;;  %v382_v32 = vmul.f32 %v378_v28, %v369_v31 }
  0x97   : > { %391 = vadd.xlane.f32.xlu1 %v390_v26  ;;  %v387_v30 = vsel %vm383_vm4, %v380_v27, 0.0 }
  0x98   : > { %v393_v33 = vsel %vm383_vm4, %v382_v32, 0.0 }
  0x9a   : > { %388 = vadd.xlane.f32.xlu0 %v387_v30 }
  0x9b   : > { %394 = vadd.xlane.f32.xlu1 %v393_v33 }
 0x123   : > { %v386_v35 = vpop.xlane.xlu0 %385 }
 0x124   : > { %v409_v39 = vadd.f32 %v405_v34, %v386_v35  ;;  %v392_v40 = vpop.xlane.xlu1 %391 }
 0x125   : > { %v411_v43 = vadd.f32 %v407_v36, %v392_v40 }
 0x126   : > { %414 = vst.msk [vmem:[%s1038_s21] sm:$0xff] %vm400_vm0, %v409_v39 }
 0x127   : > { %v389_v41 = vpop.xlane.xlu0 %388  ;;  %416 = vst.msk [vmem:[%s1038_s21 + $0x10] sm:$0xff] %vm400_vm0, %v411_v43 }
 0x128   : > { %v410_v42 = vadd.f32 %v406_v37, %v389_v41  ;;  %v395_v44 = vpop.xlane.xlu1 %394 }
 0x129   : > { %v412_v45 = vadd.f32 %v408_v38, %v395_v44 }
 0x12a   : > { %415 = vst.msk [vmem:[%s1038_s21 + $0x8] sm:$0xff] %vm400_vm0, %v410_v42 }
 0x12b   : > { %417 = vst.msk [vmem:[%s1038_s21 + $0x18] sm:$0xff] %vm400_vm0, %v412_v45 }
 0x12d   : > { %v421_v46 = vld [vmem:[%s1038_s21] sm:$0xff] }
 0x12e   : > { %v423_v48 = vld [vmem:[%s1038_s21 + $0x10] sm:$0xff]  ;;  %v425_v50 = vmul.f32 0.016666668, %v421_v46 }
 0x12f   : > { %v427_v52 = vmul.f32 0.016666668, %v423_v48 }
 0x130   : > { %429 = vst.msk [vmem:[%s1038_s21] sm:$0xff] %vm400_vm0, %v425_v50 }
 0x131   : > { %v422_v47 = vld [vmem:[%s1038_s21 + $0x8] sm:$0xff]  ;;  %431 = vst.msk [vmem:[%s1038_s21 + $0x10] sm:$0xff] %vm400_vm0, %v427_v52 }
 0x132   : > { %v424_v49 = vld [vmem:[%s1038_s21 + $0x18] sm:$0xff]  ;;  %v426_v51 = vmul.f32 0.016666668, %v422_v47 }
 0x133   : > { %v428_v53 = vmul.f32 0.016666668, %v424_v49 }
 0x134   : > { %430 = vst.msk [vmem:[%s1038_s21 + $0x8] sm:$0xff] %vm400_vm0, %v426_v51 }
 0x135   : > { %432 = vst.msk [vmem:[%s1038_s21 + $0x18] sm:$0xff] %vm400_vm0, %v428_v53 }
 0x136 PF: > { %s19_s17 = sadd.s32 1, %s813_s17   ;;  %s1146_s12 = smov %s797_s13 }
 0x137   : > { %p16_p1 = scmp.ge.s32.totalorder %s19_s17, 4   ;;  %s1147_s13 = smov %s801_s14 }
 0x138   : > { %s1148_s14 = smov %s888_s23  ;;  %s1149_s15 = smov %s809_s16 }
 0x139   : > { %s1150_s16 = smov %s1152_s19  ;;  %18 = sbr.rel (!%p16_p1) target bundleno = 6 (0x6), region = 104 }
 0x140   :  { %455 = vsyncpa [#allocation3], 1 }
 0x141   :  { %457 = vsyncpa [#allocation3 + $0x1], 1 }
 0x142   :  { %458 = vsyncpa [#allocation5], 1 }
 0x143   :  { %460 = vsyncpa [#allocation5 + $0x1], 1 }

</bundles_post_ra>
